<compile_context>
chip_gen: v6e
topology: v6e:2x2x1
jax: 0.10.0
libtpu: 0.0.40
codegen_flags: <defaults>
</compile_context>

<pallas_src>
import math
import numpy as np
import jax
import jax.numpy as jnp
from jax.experimental import pallas as pl
from jax.experimental.pallas import tpu as pltpu


VMEM_BUDGET = 8 * 1024 * 1024   # double-buffered working-set budget (bytes);
                                # safely inside every gen's default scoped VMEM.


def _cdiv(a, b):
    return -(-a // b)


def _round_up(a, m):
    return _cdiv(a, m) * m


def _lcm(a, b):
    return a * b // math.gcd(a, b)


# -----------------------------------------------------------------------------
# Deterministic parameters: db2 analysis filters (same values pywt.Wavelet('db2')
# returns; hardcoded so the script is self-contained).
# -----------------------------------------------------------------------------
def _db2_filters():
    dec_lo = np.array(
        [-0.12940952255092145, 0.22414386804185735,
          0.836516303737469,   0.48296291314469025], dtype=np.float64)
    dec_hi = np.array(
        [-0.48296291314469025, 0.836516303737469,
         -0.22414386804185735, -0.12940952255092145], dtype=np.float64)
    return dec_lo, dec_hi


def _fold_pad_conv_matrix(L, coef):
    """Fold ReflectionPad (nb//2 left, nb-1-nb//2 right) + stride-2 valid conv
    along an axis of length L into a single (L, Lout) matrix."""
    nb = len(coef)
    pad_left = nb // 2
    Lp = L + nb - 1
    Lout = (Lp - nb) // 2 + 1
    A = np.zeros((L, Lout), dtype=np.float32)
    for wo in range(Lout):
        for k in range(nb):
            i = 2 * wo + k - pad_left           # index into un-padded signal
            if i < 0:
                src = -i                        # reflect (no edge repeat)
            elif i >= L:
                src = 2 * (L - 1) - i
            else:
                src = i
            A[src, wo] += coef[k]
    return A


# -----------------------------------------------------------------------------
# Pallas kernels: one fused MXU matmul per tile, split into low/high outputs.
# -----------------------------------------------------------------------------
def _row_filter_kernel(x_ref, m_ref, low_ref, high_ref):
    # x: (TR, k*L),  m: (k*L, 2*k*Lout) with all low-pass columns first.
    out = jnp.dot(x_ref[...], m_ref[...], preferred_element_type=jnp.float32)
    no = low_ref.shape[1]
    low_ref[...] = out[:, :no].astype(low_ref.dtype)
    high_ref[...] = out[:, no:].astype(high_ref.dtype)


def _col_filter_kernel(m_ref, x_ref, low_ref, high_ref):
    # m: (2*TB*Lout, TB*H) with all low-pass rows first,  x: (TB*H, TW).
    out = jnp.dot(m_ref[...], x_ref[...], preferred_element_type=jnp.float32)
    no = low_ref.shape[0]
    low_ref[...] = out[:no, :].astype(low_ref.dtype)
    high_ref[...] = out[no:, :].astype(high_ref.dtype)


# -----------------------------------------------------------------------------
# Wrappers
# -----------------------------------------------------------------------------
def _wavelet_horizontal(x, dec_lo, dec_hi):
    N, C, H, W = x.shape
    L = W
    A_lo = _fold_pad_conv_matrix(L, dec_lo)        # (L, Lout)
    A_hi = _fold_pad_conv_matrix(L, dec_hi)
    Lout = A_lo.shape[1]
    R = N * C * H

    # Lane packing: pack k consecutive rows so the matmul K-dim is ~128 lanes.
    k = 1 if L >= 128 else max(1, 128 // L)

    # Fused block-diagonal filter matrix, low-pass columns first.
    M = np.zeros((k * L, 2 * k * Lout), dtype=np.float32)
    for j in range(k):
        M[j * L:(j + 1) * L, j * Lout:(j + 1) * Lout] = A_lo
        M[j * L:(j + 1) * L, k * Lout + j * Lout:k * Lout + (j + 1) * Lout] = A_hi
    M = jnp.asarray(M, dtype=x.dtype)

    Rp = _cdiv(R, k)                               # packed row count
    Rp8 = _round_up(Rp, 8)
    bytes_per_row = 4 * (k * L + 2 * k * Lout)
    tr_max = max(8, (VMEM_BUDGET // (2 * bytes_per_row)) // 8 * 8)
    TR = min(Rp8, tr_max, 2048)
    if TR >= Rp8 and Rp8 >= 16:                    # aim for >=2 grid steps (v7x)
        TR = _round_up(Rp8 // 2, 8)
    Rp_pad = _round_up(Rp8, TR)
    R_pad = Rp_pad * k

    x2d = x.reshape(R, L)
    if R_pad != R:
        x2d = jnp.pad(x2d, ((0, R_pad - R), (0, 0)))
    x_pack = x2d.reshape(Rp_pad, k * L)

    grid = (Rp_pad // TR,)
    low_p, high_p = pl.pallas_call(
        _row_filter_kernel,
        out_shape=(jax.ShapeDtypeStruct((Rp_pad, k * Lout), x.dtype),
                   jax.ShapeDtypeStruct((Rp_pad, k * Lout), x.dtype)),
        grid_spec=pltpu.PrefetchScalarGridSpec(
            num_scalar_prefetch=0,
            grid=grid,
            in_specs=[
                pl.BlockSpec((TR, k * L), lambda i: (i, 0)),          # x rows
                pl.BlockSpec((k * L, 2 * k * Lout), lambda i: (0, 0)),  # fused filter
            ],
            out_specs=[
                pl.BlockSpec((TR, k * Lout), lambda i: (i, 0)),
                pl.BlockSpec((TR, k * Lout), lambda i: (i, 0)),
            ],
        ),
        compiler_params=pltpu.CompilerParams(dimension_semantics=("parallel",)),
    )(x_pack, M)

    low2d = low_p.reshape(R_pad, Lout)
    high2d = high_p.reshape(R_pad, Lout)
    if R_pad != R:
        low2d, high2d = low2d[:R], high2d[:R]
    return low2d.reshape(N, C, H, Lout), high2d.reshape(N, C, H, Lout)


def _wavelet_vertical(x, dec_lo, dec_hi):
    N, C, H, W = x.shape
    A_lo = _fold_pad_conv_matrix(H, dec_lo)        # (H, Lout)
    A_hi = _fold_pad_conv_matrix(H, dec_hi)
    Lout = A_lo.shape[1]
    NC = N * C

    # Lane tiling along W only when it's large and nicely divisible.
    TW = 512 if (W >= 2048 and W % 512 == 0) else W

    # Images-per-tile: sublane alignment for the (TB*H, TW) input block and the
    # (TB*Lout, TW) output blocks; target K = TB*H ~ 128 for MXU utilization.
    align = _lcm(8 // math.gcd(H, 8), 8 // math.gcd(Lout, 8))
    TB = align * max(1, 128 // max(align * H, 1))
    TB = min(TB, _round_up(NC, align))

    def _bytes(tb):   # double-buffered x + 2 outputs + fused filter
        return 4 * 2 * (tb * H * TW + 2 * tb * Lout * TW + 2 * tb * Lout * tb * H)
    while TB > align and _bytes(TB) > VMEM_BUDGET:
        TB -= align
    # Prefer >= 2 grid steps when possible (v7x megacore).
    if _cdiv(NC, TB) < 2:
        half = max(align, (TB // 2) // align * align)
        if _cdiv(NC, half) >= 2:
            TB = half
    NC_pad = _round_up(NC, TB)

    # Fused [blockdiag(A_lo^T) ; blockdiag(A_hi^T)], low-pass rows first.
    M = np.zeros((2 * TB * Lout, TB * H), dtype=np.float32)
    for j in range(TB):
        M[j * Lout:(j + 1) * Lout, j * H:(j + 1) * H] = A_lo.T
        M[TB * Lout + j * Lout:TB * Lout + (j + 1) * Lout, j * H:(j + 1) * H] = A_hi.T
    M = jnp.asarray(M, dtype=x.dtype)

    x2d = x.reshape(NC * H, W)                     # no transpose: W stays in lanes
    if NC_pad != NC:
        x2d = jnp.pad(x2d, ((0, (NC_pad - NC) * H), (0, 0)))

    grid = (NC_pad // TB, W // TW)
    low2d, high2d = pl.pallas_call(
        _col_filter_kernel,
        out_shape=(jax.ShapeDtypeStruct((NC_pad * Lout, W), x.dtype),
                   jax.ShapeDtypeStruct((NC_pad * Lout, W), x.dtype)),
        grid_spec=pltpu.PrefetchScalarGridSpec(
            num_scalar_prefetch=0,
            grid=grid,
            in_specs=[
                pl.BlockSpec((2 * TB * Lout, TB * H), lambda i, j: (0, 0)),  # filter
                pl.BlockSpec((TB * H, TW), lambda i, j: (i, j)),             # x block
            ],
            out_specs=[
                pl.BlockSpec((TB * Lout, TW), lambda i, j: (i, j)),
                pl.BlockSpec((TB * Lout, TW), lambda i, j: (i, j)),
            ],
        ),
        compiler_params=pltpu.CompilerParams(
            dimension_semantics=("parallel", "parallel")),
    )(M, x2d)

    if NC_pad != NC:
        low2d, high2d = low2d[:NC * Lout], high2d[:NC * Lout]
    return (low2d.reshape(N, C, Lout, W), high2d.reshape(N, C, Lout, W))


def wavelet_pallas(x, horizontal=True):
    """x: (N, C, H, W) float32 NCHW.  Returns (approx, detail) like the torch module."""
    x = jnp.asarray(x)
    dec_lo, dec_hi = _db2_filters()
    if horizontal:
        return _wavelet_horizontal(x, dec_lo, dec_hi)
    return _wavelet_vertical(x, dec_lo, dec_hi)


# -----------------------------------------------------------------------------
# Pure-JAX reference that mirrors the PyTorch module literally
# (ReflectionPad2d + diagonal-weight Conv2d with stride 2).
# -----------------------------------------------------------------------------
def wavelet_reference(x, horizontal=True):
    dec_lo, dec_hi = _db2_filters()
    nb = len(dec_lo)
    C = x.shape[1]
    eye = np.eye(C, dtype=np.float32)
    lo = np.asarray(dec_lo, np.float32)
    hi = np.asarray(dec_hi, np.float32)
    if horizontal:
        pad_cfg = ((0, 0), (0, 0), (0, 0), (nb // 2, nb - 1 - nb // 2))
        w_lo = eye[:, :, None, None] * lo[None, None, None, :]   # (C, C, 1, nb)
        w_hi = eye[:, :, None, None] * hi[None, None, None, :]
        strides = (1, 2)
    else:
        pad_cfg = ((0, 0), (0, 0), (nb // 2, nb - 1 - nb // 2), (0, 0))
        w_lo = eye[:, :, None, None] * lo[None, None, :, None]   # (C, C, nb, 1)
        w_hi = eye[:, :, None, None] * hi[None, None, :, None]
        strides = (2, 1)
    xp = jnp.pad(x, pad_cfg, mode='reflect')
    dn = ('NCHW', 'OIHW', 'NCHW')
    out_lo = jax.lax.conv_general_dilated(xp, jnp.asarray(w_lo), strides, 'VALID',
                                          dimension_numbers=dn)
    out_hi = jax.lax.conv_general_dilated(xp, jnp.asarray(w_hi), strides, 'VALID',
                                          dimension_numbers=dn)
    return out_lo, out_hi


if __name__ == "__main__":
    key = jax.random.PRNGKey(0)
    x = jax.random.normal(key, (2, 4, 16, 16), dtype=jnp.float32)  # NCHW

    ok = True
    for horizontal in (True, False):
        lo, hi = wavelet_pallas(x, horizontal=horizontal)
        jax.block_until_ready((lo, hi))
        ref_lo, ref_hi = wavelet_reference(x, horizontal=horizontal)
        ok &= bool(jnp.allclose(lo, ref_lo, rtol=1e-5, atol=1e-5))
        ok &= bool(jnp.allclose(hi, ref_hi, rtol=1e-5, atol=1e-5))

    if ok:
        print("KERNEL_OK")
    else:
        print("KERNEL_MISMATCH")
</pallas_src>

<mosaic_0001>
module attributes {stable_mosaic.version = 11 : i64} {
  func.func @_row_filter_kernel(%arg0: i32, %arg1: memref<8x128xf32, #tpu.memory_space<vmem>>, %arg2: memref<128x128xf32, #tpu.memory_space<vmem>>, %arg3: memref<8x64xf32, #tpu.memory_space<vmem>>, %arg4: memref<8x64xf32, #tpu.memory_space<vmem>>) attributes {dimension_semantics = [#tpu.dimension_semantics<parallel>], iteration_bounds = array<i64: 2>, scalar_prefetch = 0 : i64, scratch_operands = 0 : i64, tpu.core_type = #tpu.core_type<tc>, window_params = [{transform_indices = @transform_0, window_bounds = array<i64: 8, 128>}, {pipeline_mode = #tpu.pipeline_mode<synchronous>, transform_indices = @transform_1, window_bounds = array<i64: 128, 128>}, {transform_indices = @transform_2, window_bounds = array<i64: 8, 64>}, {transform_indices = @transform_3, window_bounds = array<i64: 8, 64>}]} {
    %c0 = arith.constant 0 : index
    %c0_0 = arith.constant 0 : index
    %0 = vector.load %arg1[%c0, %c0_0] : memref<8x128xf32, #tpu.memory_space<vmem>>, vector<8x128xf32>
    %c0_1 = arith.constant 0 : index
    %c0_2 = arith.constant 0 : index
    %1 = vector.load %arg2[%c0_1, %c0_2] : memref<128x128xf32, #tpu.memory_space<vmem>>, vector<128x128xf32>
    %cst = arith.constant dense<0.000000e+00> : vector<8x128xf32>
    %2 = tpu.matmul %0, %1, %cst {dimension_numbers = #tpu.dot_dimension_numbers<[1], [0], [0], [1], [0, 0, 1, 1], [], []>} : vector<8x128xf32>, vector<128x128xf32>, vector<8x128xf32> -> vector<8x128xf32>
    %3 = vector.extract_strided_slice %2 {offsets = [0, 0], sizes = [8, 64], strides = [1, 1]} : vector<8x128xf32> to vector<8x64xf32>
    %c0_3 = arith.constant 0 : index
    %c0_4 = arith.constant 0 : index
    %4 = vector.load %arg3[%c0_3, %c0_4] : memref<8x64xf32, #tpu.memory_space<vmem>>, vector<8x64xf32>
    tpu.vector_store %arg3[%c0_3, %c0_4], %3 {strides = array<i32>} : memref<8x64xf32, #tpu.memory_space<vmem>>, vector<8x64xf32>,
    %5 = vector.extract_strided_slice %2 {offsets = [0, 64], sizes = [8, 64], strides = [1, 1]} : vector<8x128xf32> to vector<8x64xf32>
    %c0_5 = arith.constant 0 : index
    %c0_6 = arith.constant 0 : index
    %6 = vector.load %arg4[%c0_5, %c0_6] : memref<8x64xf32, #tpu.memory_space<vmem>>, vector<8x64xf32>
    tpu.vector_store %arg4[%c0_5, %c0_6], %5 {strides = array<i32>} : memref<8x64xf32, #tpu.memory_space<vmem>>, vector<8x64xf32>,
    return
  }
  func.func @transform_0(%arg0: i32) -> (i32, i32) {
    %c0_i32 = arith.constant 0 : i32
    %c0_i32_0 = arith.constant 0 : i32
    return %arg0, %c0_i32 : i32, i32
  }
  func.func @transform_1(%arg0: i32) -> (i32, i32) {
    %c0_i32 = arith.constant 0 : i32
    %c0_i32_0 = arith.constant 0 : i32
    %c0_i32_1 = arith.constant 0 : i32
    return %c0_i32, %c0_i32_0 : i32, i32
  }
  func.func @transform_2(%arg0: i32) -> (i32, i32) {
    %c0_i32 = arith.constant 0 : i32
    %c0_i32_0 = arith.constant 0 : i32
    return %arg0, %c0_i32 : i32, i32
  }
  func.func @transform_3(%arg0: i32) -> (i32, i32) {
    %c0_i32 = arith.constant 0 : i32
    %c0_i32_0 = arith.constant 0 : i32
    return %arg0, %c0_i32 : i32, i32
  }
}

</mosaic_0001>

<bundles_post_ra>
// kernel: tpu_custom_call.1
= control target key start
LH: loop header
LB: loop body
LE: loop exit
PB: predicated region body
PF: predicated region fallthrough
CT: control target
= control target key end

     0   :  { %9 = vsyncpa [#allocation3], 0  ;;  %s970_s0 = inlined_call_operand.hbm [shape: f32[16,128], index: 0, kind: input, shape index: {}]   ;;  %s971_s1 = inlined_call_operand.hbm [shape: f32[128,128], index: 1, kind: input, shape index: {}]   ;;  %s972_s2 = inlined_call_operand.hbm [shape: f32[16,64], index: 2, kind: output, shape index: {0}]   ;;  %s973_s3 = inlined_call_operand.hbm [shape: f32[16,64], index: 3, kind: output, shape index: {1}]  }
   0x1   :  { %11 = vsyncpa [#allocation3 + $0x1], 0 }
   0x2   :  { %12 = vsyncpa [#allocation6], 0 }
   0x3   :  { %13 = vsyncpa [#allocation4], 0 }
   0x4   :  { %15 = vsyncpa [#allocation4 + $0x1], 0 }
   0x5   :  { %16 = vsyncpa [#allocation9], 0 }
   0x6   :  { %18 = vsyncpa [#allocation9 + $0x1], 0  ;;  %s769_s12 = smov 0   ;;  %s771_s13 = smov 0  }
   0x7   :  { %s773_s14 = smov 0   ;;  %s775_s15 = smov 0  }
   0x8 LB: > { %s790_s16 = sadd.s32 4294967295, %s738_s15   ;;  %s450_s17 = sadd.s32 4294967294, %s738_s15   ;;  %s738_s15 = sphi %s775_s15, %s995_s15   ;;  %s734_s14 = sphi %s773_s14, %s994_s14   ;;  %s730_s13 = sphi %s771_s13, %s993_s13   ;;  %s726_s12 = sphi %s769_s12, %s992_s12  }
   0x9   : > { %p44_p0 = scmp.ne.s32.totalorder %s730_s13, %s726_s12  ;;  %p974_p1 = scmp.eq.s32.totalorder %s790_s16, 0 }
   0xa   : > { %p95_p3 = scmp.eq.s32.totalorder %s450_s17, 1  ;;  %p451_p5 = scmp.ge.s32.totalorder %s738_s15, 1 }
   0xb   : > { %p799_p4 = por %p974_p1, %p44_p0  ;;  %p128_p7 = scmp.lt.s32.totalorder %s738_s15, 3 }
   0xc   : > { %p804_p6 = por %p95_p3, %p44_p0  ;;  %s740_s21 = smov [#allocation5]  }
   0xd   : > { %s978_s18 = scalar_select %p799_p4, 1, 0 }
   0xe   : > { %s979_s19 = scalar_select %p804_p6, 1, 0 }
   0xf   : > { %p809_p8 = pnand %p451_p5, %p128_p7  ;;  %s140_s22 = sshll.u32 %s740_s21, 4  ;;  %s141_s22 = int_to_ptr.vmem [resolvable:$true] %s140_s22 }
  0x10   : > { %s823_s24 = sadd.s32 1, %s738_s15   ;;  %s31_s25 = sadd.s32 1, %s734_s14 }
  0x11   : > { %s980_s20 = scalar_select %p809_p8, 1, 0 }
  0x12   : > { %p529_p9 = pneg %p809_p8  ;;  %s28_s26 = ssub.s32 %s738_s15, %s823_s24 }
  0x13   : > { %s597_s27 = scalar_lea.vmem %s141_s22, 2048  ;;  %p605_p5 = scmp.lt.s32.totalorder %s141_s22, %s141_s22 }
  0x14   : > { %p818_p11 = pnand %p529_p9, %p974_p1  ;;  %p598_p13 = scmp.ne.s32.totalorder %s141_s22, %s597_s27 }
  0x15   : > { %p606_p7 = scmp.lt.s32.totalorder %s597_s27, %s597_s27 }
  0x16   : > { %p588_p12 = pneg %p818_p11 }
  0x17   : > { %p607_p10 = por %p606_p7, %p605_p5 }
  0x18   : > { %p600_p0 = pnand %p598_p13, %p588_p12 }
  0x1a   : > { %p601_p3 = pneg %p600_p0 }
  0x1c   : > { %p608_p2 = pnand %p607_p10, %p601_p3 }
  0x1e   : > { %611 = shalt.err (!%p608_p2)
}
  0x1f   : > { %s741_s28 = smov 128   ;;  %s742_s29 = smov 8  }
  0x20   : > { %532 = dma.hbm_to_vmem [thread:$0]  (!%p818_p11), %s971_s1, 2048, %s141_s22, [#allocation6], %s741_s28, %s741_s28, %s742_s29  }
  0x21   : > { %p29_p9 = scmp.eq.s32.totalorder %s28_s26, 0  ;;  %p38_p12 = scmp.ne.s32.totalorder %s734_s14, %s730_s13 }
  0x22   : > { %p39_p10 = scmp.eq.s32.totalorder %s738_s15, 0  ;;  %p545_p2 = scmp.lt.s32.totalorder %s738_s15, 2 }
  0x23   : > { %s840_s5 = scalar_select %p29_p9, %s734_s14, %s31_s25  }
  0x24   : > { %p40_p13 = por %p39_p10, %p38_p12  ;;  %p982_p0 = scmp.eq.s32.totalorder %s790_s16, 1 }
  0x25   : > { %s154_s7 = sand.u32 1, %s734_s14   ;;  %s455_s8 = sshll.u32 %s738_s15, 7 }
  0x26   : > { %p844_p3 = por %p982_p0, %p38_p12  ;;  %s454_s9 = sshll.u32 %s154_s7, 3 }
  0x27   : > { %s853_s17 = scalar_lea.hbm %s970_s0, %s455_s8  ;;  %s158_s21 = scalar_lea.vmem [#allocation2], %s454_s9 }
  0x28   : > { %s983_s6 = scalar_select %p844_p3, 1, 0 }
  0x29   : > { %s165_s22 = sshll.u32 %s158_s21, 4  ;;  %p855_p11 = pnand %p545_p2, %p40_p13  ;;  %s166_s22 = int_to_ptr.vmem [resolvable:$true] %s165_s22 }
  0x2a   : > { %s155_s25 = scalar_lea.sflag [#allocation3], %s154_s7  ;;  %s612_s26 = scalar_lea.hbm %s853_s17, 128 }
  0x2b   : > { %p613_p5 = scmp.ne.s32.totalorder %s853_s17, %s612_s26  ;;  %p614_p7 = pneg %p855_p11 }
  0x2c   : > { %s617_s29 = scalar_lea.hbm %s970_s0, 256  ;;  %p618_p10 = scmp.lt.s32.totalorder %s853_s17, %s970_s0 }
  0x2d   : > { %p615_p9 = pnand %p614_p7, %p613_p5  ;;  %p619_p2 = scmp.lt.s32.totalorder %s617_s29, %s612_s26 }
  0x2f   : > { %p616_p12 = pneg %p615_p9  ;;  %p620_p13 = por %p619_p2, %p618_p10 }
  0x31   : > { %p621_p0 = pnand %p620_p13, %p616_p12 }
  0x33   : > { %624 = shalt.err (!%p621_p0)
}
  0x34   : > { %s625_s8 = scalar_lea.vmem %s166_s22, 128  ;;  %s743_s7 = smov [#allocation2]  }
  0x35   : > { %p626_p1 = scmp.ne.s32.totalorder %s166_s22, %s625_s8  ;;  %s630_s9 = sshll.u32 %s743_s7, 4  ;;  %s631_s9 = int_to_ptr.vmem [resolvable:$false] %s630_s9 }
  0x36   : > { %s632_s10 = scalar_lea.vmem %s631_s9, 256  ;;  %p633_p5 = scmp.lt.s32.totalorder %s166_s22, %s631_s9 }
  0x37   : > { %p628_p6 = pnand %p626_p1, %p614_p7  ;;  %p634_p9 = scmp.lt.s32.totalorder %s632_s10, %s625_s8 }
  0x39   : > { %p629_p3 = pneg %p628_p6  ;;  %p635_p4 = por %p634_p9, %p633_p5 }
  0x3b   : > { %p636_p8 = pnand %p635_p4, %p629_p3 }
  0x3d   : > { %639 = shalt.err (!%p636_p8)
}
  0x3e   : > { %536 = dma.hbm_to_vmem [thread:$0]  (!%p855_p11), %s853_s17, 128, %s166_s22, %s155_s25  }
  0x3f   : > { %p985_p12 = scmp.ne.s32.totalorder %s980_s20, 0 }
  0x40   : > { %s876_s11 = sand.u32 (!%p985_p12), 1, %s730_s13   ;;  %p986_p1 = scmp.ne.s32.totalorder (!%p985_p12), %s978_s18, 0 }
  0x41   : > { %174 = sbr.rel (%p985_p12) target bundleno = 428 (0x1ac), region = 28  ;;  %s879_s21 = sshll.u32 (!%p985_p12), %s876_s11, 3 }
  0x42   : > { %s177_s26 = scalar_lea.sflag (!%p985_p12), [#allocation3], %s876_s11  ;;  %s180_s27 = scalar_lea.vmem (!%p985_p12), [#allocation2], %s879_s21 }
  0x46   : > { %709 = dma.done.wait (%p986_p1), %s177_s26, 128  }
  0x47   : > { %711 = vsyncadd (%p986_p1), %s177_s26, 4294967168  ;;  %p987_p4 = scmp.eq.s32.totalorder %s790_s16, 0 }
  0x49   : > { %713 = dma.done.wait (%p987_p4), [#allocation6], 2048   ;;  %p988_p6 = pmov %p987_p4 }
  0x4a   : > { %v744_v0 = vmov 0.0   ;;  %vm745_vm0 = vmmov 0   ;;  %v228_v1 = vld [vmem:[#allocation5 + $0x78] sm:$0xff]  ;;  %v227_v2 = vld [vmem:[#allocation5 + $0x70] sm:$0xff]  ;;  %v226_v3 = vld [vmem:[#allocation5 + $0x68] sm:$0xff]  ;;  %s463_s18 = sshll.u32 %s790_s16, 7 }
  0x4b   : > { %715 = vsyncadd (%p988_p6), [#allocation6], 4294965248  ;;  %484 = vmatprep.subr.mxu0 %v744_v0  ;;  %516 = vmatprep.mubr.msk.f32.mxu0 %vm745_vm0, %v744_v0  ;;  %v225_v4 = vld [vmem:[#allocation5 + $0x60] sm:$0xff]  ;;  %v224_v5 = vld [vmem:[#allocation5 + $0x58] sm:$0xff]  ;;  %s204_s20 = scalar_lea.vmem [#allocation7], %s879_s21  ;;  %vm299_vm1 = vcmask 523264   ;;  %s900_s25 = scalar_lea.hbm %s972_s2, %s463_s18 }
  0x4c   : > { %485 = vmatpush3.msra.mxu0 %v228_v1  ;;  %v223_v6 = vld [vmem:[#allocation5 + $0x50] sm:$0xff]  ;;  %v222_v7 = vld [vmem:[#allocation5 + $0x48] sm:$0xff]  ;;  %v221_v8 = vld [vmem:[#allocation5 + $0x40] sm:$0xff]  ;;  %s325_s17 = sshll.u32 %s204_s20, 4  ;;  %s746_s28 = smov 64   ;;  %s902_s17 = int_to_ptr.vmem [resolvable:$true] %s325_s17 }
  0x4d   : > { %486 = vmatprep.subr.mxu0 %v744_v0  ;;  %v220_v9 = vld [vmem:[#allocation5 + $0x38] sm:$0xff]  ;;  %v219_v10 = vld [vmem:[#allocation5 + $0x30] sm:$0xff]  ;;  %v218_v11 = vld [vmem:[#allocation5 + $0x28] sm:$0xff]  ;;  %s307_s29 = scalar_lea.sflag [#allocation4], %s876_s11  ;;  %s640_s30 = scalar_lea.vmem %s902_s17, 128 }
  0x4e   : > { %487 = vmatpush3.msra.mxu0 %v227_v2  ;;  %v217_v12 = vld [vmem:[#allocation5 + $0x20] sm:$0xff]  ;;  %v216_v13 = vld [vmem:[#allocation5 + $0x18] sm:$0xff]  ;;  %v215_v14 = vld [vmem:[#allocation5 + $0x10] sm:$0xff]  ;;  %p641_p8 = scmp.ne.s32.totalorder %s902_s17, %s640_s30  ;;  %p989_p3 = scmp.ne.s32.totalorder %s983_s6, 0 }
  0x4f   : > { %488 = vmatprep.subr.mxu0 %v744_v0  ;;  %v214_v15 = vld [vmem:[#allocation5 + $0x8] sm:$0xff]  ;;  %v213_v16 = vld [vmem:[#allocation5] sm:$0xff]  ;;  %v212_v17 = vld [vmem:[%s180_s27] sm:$0xff]  ;;  %s747_s4 = smov [#allocation7]  }
  0x50   : > { %489 = vmatpush3.msra.mxu0 %v226_v3  ;;  %p642_p11 = pnand %p641_p8, %p989_p3  ;;  %s644_s8 = sshll.u32 %s747_s4, 4  ;;  %s645_s8 = int_to_ptr.vmem [resolvable:$false] %s644_s8 }
  0x51   : > { %490 = vmatprep.subr.mxu0 %v744_v0  ;;  %s646_s7 = scalar_lea.vmem %s645_s8, 256  ;;  %p647_p10 = scmp.lt.s32.totalorder %s902_s17, %s645_s8 }
  0x52   : > { %491 = vmatpush3.msra.mxu0 %v225_v4  ;;  %p643_p7 = pneg %p642_p11  ;;  %p648_p2 = scmp.lt.s32.totalorder %s646_s7, %s640_s30 }
  0x53   : > { %492 = vmatprep.subr.mxu0 %v744_v0 }
  0x54   : > { %493 = vmatpush3.msra.mxu0 %v224_v5  ;;  %p649_p13 = por %p648_p2, %p647_p10 }
  0x55   : > { %494 = vmatprep.subr.mxu0 %v744_v0 }
  0x56   : > { %495 = vmatpush3.msra.mxu0 %v223_v6  ;;  %p650_p0 = pnand %p649_p13, %p643_p7 }
  0x57   : > { %496 = vmatprep.subr.mxu0 %v744_v0 }
  0x58   : > { %497 = vmatpush3.msra.mxu0 %v222_v7 }
  0x59   : > { %498 = vmatprep.subr.mxu0 %v744_v0 }
  0x5a   : > { %499 = vmatpush3.msra.mxu0 %v221_v8 }
  0x5b   : > { %500 = vmatprep.subr.mxu0 %v744_v0 }
  0x5c   : > { %501 = vmatpush3.msra.mxu0 %v220_v9 }
  0x5d   : > { %502 = vmatprep.subr.mxu0 %v744_v0 }
  0x5e   : > { %503 = vmatpush3.msra.mxu0 %v219_v10 }
  0x5f   : > { %504 = vmatprep.subr.mxu0 %v744_v0 }
  0x60   : > { %505 = vmatpush3.msra.mxu0 %v218_v11 }
  0x61   : > { %506 = vmatprep.subr.mxu0 %v744_v0 }
  0x62   : > { %507 = vmatpush3.msra.mxu0 %v217_v12 }
  0x63   : > { %508 = vmatprep.subr.mxu0 %v744_v0 }
  0x64   : > { %509 = vmatpush3.msra.mxu0 %v216_v13 }
  0x65   : > { %510 = vmatprep.subr.mxu0 %v744_v0 }
  0x66   : > { %511 = vmatpush3.msra.mxu0 %v215_v14 }
  0x67   : > { %512 = vmatprep.subr.mxu0 %v744_v0 }
  0x68   : > { %513 = vmatpush3.msra.mxu0 %v214_v15 }
  0x69   : > { %514 = vmatprep.subr.mxu0 %v744_v0 }
  0x6a   : > { %515 = vmatpush3.msra.mxu0 %v213_v16 }
  0x6b   : > { %517 = vmatmul.mubr.f32.vlgmr.msra.gmra.mxu0 %v212_v17 }
 0x12b   : > { %v295_v18 = vpop.f32.mrf.mxu0 }
 0x12c   : > { %300 = vst.msk [vmem:[%s204_s20] sm:$0xff] %vm299_vm1, %v295_v18  ;;  %302 = vrot.lane.b32.xlu0 %v295_v18, %s746_s28 }
 0x12d   : > { %v518_v19 = vpop.f32.mrf.mxu0 }
 0x12e   : > { %653 = shalt.err (!%p650_p0)
}
 0x12f   : > { %s654_s9 = scalar_lea.hbm %s900_s25, 128  ;;  %s658_s27 = scalar_lea.hbm %s972_s2, 256 }
 0x130   : > { %p655_p5 = scmp.ne.s32.totalorder %s900_s25, %s654_s9  ;;  %p659_p1 = scmp.lt.s32.totalorder %s900_s25, %s972_s2 }
 0x131   : > { %p660_p4 = scmp.lt.s32.totalorder %s658_s27, %s654_s9 }
 0x132   : > { %p656_p9 = pnand %p655_p5, %p989_p3 }
 0x133   : > { %p661_p6 = por %p660_p4, %p659_p1 }
 0x134   : > { %p657_p12 = pneg %p656_p9 }
 0x136   : > { %p662_p8 = pnand %p661_p6, %p657_p12 }
 0x138   : > { %665 = shalt.err (!%p662_p8)
}
 0x139   : > { %525 = dma.vmem_to_hbm [thread:$0]  (%p989_p3), %s902_s17, 128, %s900_s25, %s307_s29  }
 0x13a   : > { %s211_s23 = scalar_lea.vmem [#allocation8], %s879_s21  ;;  %s932_s8 = scalar_lea.hbm %s973_s3, %s463_s18 }
 0x13b   : > { %s338_s28 = sshll.u32 %s211_s23, 4  ;;  %s312_s7 = scalar_lea.sflag [#allocation9], %s876_s11  ;;  %s339_s28 = int_to_ptr.vmem [resolvable:$true] %s338_s28 }
 0x13c   : > { %s666_s9 = scalar_lea.vmem %s339_s28, 128  ;;  %s748_s10 = smov [#allocation8]  }
 0x13d   : > { %p667_p11 = scmp.ne.s32.totalorder %s339_s28, %s666_s9  ;;  %s670_s17 = sshll.u32 %s748_s10, 4  ;;  %s671_s17 = int_to_ptr.vmem [resolvable:$false] %s670_s17 }
 0x13e   : > { %s672_s21 = scalar_lea.vmem %s671_s17, 256  ;;  %p673_p2 = scmp.lt.s32.totalorder %s339_s28, %s671_s17 }
 0x13f   : > { %p668_p7 = pnand %p667_p11, %p989_p3  ;;  %p674_p13 = scmp.lt.s32.totalorder %s672_s21, %s666_s9 }
 0x141   : > { %p669_p10 = pneg %p668_p7  ;;  %p675_p0 = por %p674_p13, %p673_p2 }
 0x143   : > { %p676_p5 = pnand %p675_p0, %p669_p10 }
 0x19e   : > { %v303_v20 = vpop.permute.xlu0 %302 }
 0x19f   : > { %305 = vst.msk [vmem:[%s211_s23] sm:$0xff] %vm299_vm1, %v303_v20 }
 0x1a0   : > { %679 = shalt.err (!%p676_p5)
}
 0x1a1   : > { %s680_s16 = scalar_lea.hbm %s932_s8, 128  ;;  %s684_s25 = scalar_lea.hbm %s973_s3, 256 }
 0x1a2   : > { %p681_p9 = scmp.ne.s32.totalorder %s932_s8, %s680_s16  ;;  %p685_p4 = scmp.lt.s32.totalorder %s932_s8, %s973_s3 }
 0x1a3   : > { %p686_p6 = scmp.lt.s32.totalorder %s684_s25, %s680_s16 }
 0x1a4   : > { %p682_p12 = pnand %p681_p9, %p989_p3 }
 0x1a5   : > { %p687_p8 = por %p686_p6, %p685_p4 }
 0x1a6   : > { %p683_p1 = pneg %p682_p12 }
 0x1a8   : > { %p688_p11 = pnand %p687_p8, %p683_p1 }
 0x1aa   : > { %691 = shalt.err (!%p688_p11)
}
 0x1ab   : > { %526 = dma.vmem_to_hbm [thread:$0]  (%p989_p3), %s339_s28, 128, %s932_s8, %s312_s7  }
 0x1ac PF: > { %s350_s27 = sand.u32 1, %s726_s12   ;;  %p990_p7 = scmp.ne.s32.totalorder %s979_s19, 0 }
 0x1ad   : > { %p991_p10 = scmp.ge.s32.totalorder %s738_s15, 2  ;;  %s351_s20 = scalar_lea.sflag [#allocation4], %s350_s27 }
 0x1af   : > { %p538_p2 = pnand %p991_p10, %p990_p7 }
 0x1b1   : > { %p539_p13 = pneg %p538_p2 }
 0x1b3   : > { %717 = dma.done.wait (%p539_p13), %s351_s20, 128  }
 0x1b4   : > { %719 = vsyncadd (%p539_p13), %s351_s20, 4294967168  ;;  %s360_s22 = scalar_lea.sflag [#allocation9], %s350_s27 }
 0x1b5   : > { %721 = dma.done.wait (%p539_p13), %s360_s22, 128  }
 0x1b6   : > { %723 = vsyncadd (%p539_p13), %s360_s22, 4294967168  ;;  %p21_p3 = scmp.ge.s32.totalorder %s823_s24, 4   ;;  %s992_s12 = smov %s730_s13 }
 0x1b7   : > { %s993_s13 = smov %s734_s14  ;;  %s994_s14 = smov %s840_s5 }
 0x1b8   : > { %s995_s15 = smov %s823_s24  ;;  %23 = sbr.rel (!%p21_p3) target bundleno = 8 (0x8), region = 94 }
 0x1bd   :  { %365 = vsyncpa [#allocation3], 1 }
 0x1be   :  { %367 = vsyncpa [#allocation3 + $0x1], 1 }
 0x1bf   :  { %368 = vsyncpa [#allocation6], 1 }
 0x1c0   :  { %369 = vsyncpa [#allocation4], 1 }
 0x1c1   :  { %371 = vsyncpa [#allocation4 + $0x1], 1 }
 0x1c2   :  { %372 = vsyncpa [#allocation9], 1 }
 0x1c3   :  { %374 = vsyncpa [#allocation9 + $0x1], 1 }

</bundles_post_ra>
